<compile_context>
chip_gen: v7x
topology: tpu7x:2x2x1
jax: 0.10.0
libtpu: 0.0.40
codegen_flags: <defaults>
</compile_context>

<pallas_src>
import jax
import jax.numpy as jnp
from jax.experimental import pallas as pl
from jax.experimental.pallas import tpu as pltpu


# Cap on lanes per block: keeps double-buffered blocks tiny even on v5e's
# 16 MiB default scoped VMEM, while staying a large multiple of 128.
_LANE_TILE_CAP = 8192


def _round_up(a: int, b: int) -> int:
    return (a + b - 1) // b * b


def _conv1x1_affine_kernel(x_ref, w_ref, b_ref, o_ref):
    # x_ref: (N, Cin, TS)   zero-padded input, spatial flattened + lane-padded
    # w_ref: (Cout, Cin)    folded weight  (lw * conv_w)
    # b_ref: (Cout, 1)      folded bias    (lw * conv_b + lb + x2)
    # o_ref: (N, Cout, TS)
    n_img, cin, ts = x_ref.shape
    cout = w_ref.shape[0]
    w = w_ref[...]

    # Hoist the per-channel weight-column lane broadcasts and the bias
    # broadcast out of the unrolled loops (materialized once, reused N times).
    wb = [jnp.broadcast_to(w[:, ci:ci + 1], (cout, ts)) for ci in range(cin)]
    bb = jnp.broadcast_to(b_ref[...], (cout, ts))

    # Static unroll over the (small) batch; unrolled VPU broadcast-FMAs over
    # the lane-dense spatial axis for the K=3 channel contraction (no MXU).
    for n in range(n_img):
        x = x_ref[n]                              # (Cin, TS)
        acc = bb + wb[0] * x[0:1, :]              # (Cout, TS)
        for ci in range(1, cin):
            acc = acc + wb[ci] * x[ci:ci + 1, :]
        o_ref[n] = acc.astype(o_ref.dtype)


def model_forward(x1, x2, conv_w, conv_b, lin_w, lin_b):
    """x1: (N, Cin, H, W) float32 (NCHW). Returns (N, Cout, H+2, W+2) float32."""
    N, Cin, H, W = x1.shape
    Cout = conv_w.shape[0]
    Hp, Wp = H + 2, W + 2
    S = Hp * Wp

    lw = jnp.asarray(lin_w, jnp.float32).reshape(())
    lb = jnp.asarray(lin_b, jnp.float32).reshape(())

    # Fold Linear(1,1) affine and "+ x2" into the conv parameters.
    # NOTE: this fold is only valid because x2 is a scalar (or per-channel
    # broadcastable); a tensor x2 would have to be passed into the kernel.
    w_eff = (lw * conv_w.reshape(Cout, Cin)).astype(jnp.float32)          # (Cout, Cin)
    b_eff = (lw * conv_b.reshape(Cout) + lb + jnp.float32(x2))
    b_eff = b_eff.astype(jnp.float32).reshape(Cout, 1)                    # (Cout, 1)

    # Zero-pad for padding=1 (zero border * weight -> bias-only border, so no
    # in-kernel masking), flatten the spatial axis (free contiguous collapse),
    # then pad the lane axis up to a multiple of 128 (unmasked stores).
    x_pad = jnp.pad(x1.astype(jnp.float32), ((0, 0), (0, 0), (1, 1), (1, 1)))
    x_flat = x_pad.reshape(N, Cin, S)

    tile_s = min(_round_up(S, 128), _LANE_TILE_CAP)     # lanes per block
    s_total = _round_up(S, tile_s)                      # padded spatial extent
    if s_total > S:
        x_flat = jnp.pad(x_flat, ((0, 0), (0, 0), (0, s_total - S)))
    grid = (s_total // tile_s,)                         # == (1,) at small H*W

    cost = pl.CostEstimate(
        flops=2 * N * Cout * Cin * s_total,
        transcendentals=0,
        bytes_accessed=4 * (N * Cin * s_total + N * Cout * s_total
                            + Cout * Cin + Cout),
    )

    out_flat = pl.pallas_call(
        _conv1x1_affine_kernel,
        out_shape=jax.ShapeDtypeStruct((N, Cout, s_total), jnp.float32),
        grid=grid,
        in_specs=[
            pl.BlockSpec((N, Cin, tile_s), lambda s: (0, 0, s)),   # activations
            pl.BlockSpec((Cout, Cin), lambda s: (0, 0)),           # folded weight
            pl.BlockSpec((Cout, 1), lambda s: (0, 0)),             # folded bias
        ],
        out_specs=pl.BlockSpec((N, Cout, tile_s), lambda s: (0, 0, s)),
        compiler_params=pltpu.CompilerParams(
            dimension_semantics=("parallel",)),
        cost_estimate=cost,
    )(x_flat, w_eff, b_eff)

    # Drop the lane padding; free contiguous split back to NCHW spatial dims.
    return out_flat[:, :, :S].reshape(N, Cout, Hp, Wp)


if __name__ == "__main__":
    key = jax.random.PRNGKey(0)
    k1, k2, k3, k4, k5 = jax.random.split(key, 5)

    # Small shapes consistent with the module: Conv2d(3, 8, 1, padding=1)
    N, Cin, H, W, Cout = 2, 3, 16, 16, 8
    x1 = jax.random.normal(k1, (N, Cin, H, W), dtype=jnp.float32)
    x2 = 1  # python scalar, as in the torch script

    conv_w = jax.random.normal(k2, (Cout, Cin, 1, 1), dtype=jnp.float32) * 0.1
    conv_b = jax.random.normal(k3, (Cout,), dtype=jnp.float32) * 0.1
    lin_w = jax.random.normal(k4, (), dtype=jnp.float32)   # Linear(1,1) weight scalar
    lin_b = jax.random.normal(k5, (), dtype=jnp.float32)   # Linear(1,1) bias scalar

    out = model_forward(x1, x2, conv_w, conv_b, lin_w, lin_b)
    out = jax.block_until_ready(out)

    # Pure-JAX reference (stays in NCHW).
    x_pad_ref = jnp.pad(x1, ((0, 0), (0, 0), (1, 1), (1, 1)))
    conv_ref = jnp.einsum("nchw,oc->nohw", x_pad_ref, conv_w.reshape(Cout, Cin))
    conv_ref = conv_ref + conv_b[None, :, None, None]
    ref = lin_w * conv_ref + lin_b + x2

    assert out.shape == (N, Cout, H + 2, W + 2)
    assert jnp.allclose(out, ref, atol=1e-4, rtol=1e-4)

    print("KERNEL_OK")
</pallas_src>

<mosaic_0001>
module attributes {stable_mosaic.version = 11 : i64} {
  func.func @_conv1x1_affine_kernel(%arg0: i32, %arg1: memref<2x3x384xf32, #tpu.memory_space<vmem>>, %arg2: memref<8x3xf32, #tpu.memory_space<vmem>>, %arg3: memref<8x1xf32, #tpu.memory_space<vmem>>, %arg4: memref<2x8x384xf32, #tpu.memory_space<vmem>>) attributes {dimension_semantics = [#tpu.dimension_semantics<parallel>], iteration_bounds = array<i64: 1>, scalar_prefetch = 0 : i64, scratch_operands = 0 : i64, tpu.core_type = #tpu.core_type<tc>, window_params = [{transform_indices = @transform_0, window_bounds = array<i64: 2, 3, 384>}, {pipeline_mode = #tpu.pipeline_mode<synchronous>, transform_indices = @transform_1, window_bounds = array<i64: 8, 3>}, {pipeline_mode = #tpu.pipeline_mode<synchronous>, transform_indices = @transform_2, window_bounds = array<i64: 8, 1>}, {transform_indices = @transform_3, window_bounds = array<i64: 2, 8, 384>}]} {
    %c0 = arith.constant 0 : index
    %c0_0 = arith.constant 0 : index
    %0 = vector.load %arg2[%c0, %c0_0] : memref<8x3xf32, #tpu.memory_space<vmem>>, vector<8x3xf32>
    %1 = vector.extract_strided_slice %0 {offsets = [0, 0], sizes = [8, 1], strides = [1, 1]} : vector<8x3xf32> to vector<8x1xf32>
    %2 = vector.shape_cast %1 : vector<8x1xf32> to vector<8x1xf32>
    %3 = vector.broadcast %2 : vector<8x1xf32> to vector<8x384xf32>
    %4 = vector.extract_strided_slice %0 {offsets = [0, 1], sizes = [8, 1], strides = [1, 1]} : vector<8x3xf32> to vector<8x1xf32>
    %5 = vector.shape_cast %4 : vector<8x1xf32> to vector<8x1xf32>
    %6 = vector.broadcast %5 : vector<8x1xf32> to vector<8x384xf32>
    %7 = vector.extract_strided_slice %0 {offsets = [0, 2], sizes = [8, 1], strides = [1, 1]} : vector<8x3xf32> to vector<8x1xf32>
    %8 = vector.shape_cast %7 : vector<8x1xf32> to vector<8x1xf32>
    %9 = vector.broadcast %8 : vector<8x1xf32> to vector<8x384xf32>
    %c0_1 = arith.constant 0 : index
    %c0_2 = arith.constant 0 : index
    %10 = vector.load %arg3[%c0_1, %c0_2] : memref<8x1xf32, #tpu.memory_space<vmem>>, vector<8x1xf32>
    %11 = vector.shape_cast %10 : vector<8x1xf32> to vector<8x1xf32>
    %12 = vector.broadcast %11 : vector<8x1xf32> to vector<8x384xf32>
    %c0_3 = arith.constant 0 : index
    %c0_4 = arith.constant 0 : index
    %c0_5 = arith.constant 0 : index
    %13 = vector.load %arg1[%c0_3, %c0_4, %c0_5] : memref<2x3x384xf32, #tpu.memory_space<vmem>>, vector<1x3x384xf32>
    %14 = vector.shape_cast %13 : vector<1x3x384xf32> to vector<3x384xf32>
    %15 = vector.extract_strided_slice %14 {offsets = [0, 0], sizes = [1, 384], strides = [1, 1]} : vector<3x384xf32> to vector<1x384xf32>
    %16 = vector.broadcast %15 : vector<1x384xf32> to vector<8x384xf32>
    %17 = arith.mulf %3, %16 : vector<8x384xf32>
    %18 = arith.addf %12, %17 : vector<8x384xf32>
    %19 = vector.extract_strided_slice %14 {offsets = [1, 0], sizes = [1, 384], strides = [1, 1]} : vector<3x384xf32> to vector<1x384xf32>
    %20 = vector.broadcast %19 : vector<1x384xf32> to vector<8x384xf32>
    %21 = arith.mulf %6, %20 : vector<8x384xf32>
    %22 = arith.addf %18, %21 : vector<8x384xf32>
    %23 = vector.extract_strided_slice %14 {offsets = [2, 0], sizes = [1, 384], strides = [1, 1]} : vector<3x384xf32> to vector<1x384xf32>
    %24 = vector.broadcast %23 : vector<1x384xf32> to vector<8x384xf32>
    %25 = arith.mulf %9, %24 : vector<8x384xf32>
    %26 = arith.addf %22, %25 : vector<8x384xf32>
    %c0_6 = arith.constant 0 : index
    %c0_7 = arith.constant 0 : index
    %c0_8 = arith.constant 0 : index
    %27 = vector.load %arg4[%c0_6, %c0_7, %c0_8] : memref<2x8x384xf32, #tpu.memory_space<vmem>>, vector<1x8x384xf32>
    %28 = vector.shape_cast %27 : vector<1x8x384xf32> to vector<8x384xf32>
    %29 = vector.shape_cast %26 : vector<8x384xf32> to vector<1x8x384xf32>
    tpu.vector_store %arg4[%c0_6, %c0_7, %c0_8], %29 {strides = array<i32>} : memref<2x8x384xf32, #tpu.memory_space<vmem>>, vector<1x8x384xf32>,
    %c1 = arith.constant 1 : index
    %c0_9 = arith.constant 0 : index
    %c0_10 = arith.constant 0 : index
    %30 = vector.load %arg1[%c1, %c0_9, %c0_10] : memref<2x3x384xf32, #tpu.memory_space<vmem>>, vector<1x3x384xf32>
    %31 = vector.shape_cast %30 : vector<1x3x384xf32> to vector<3x384xf32>
    %32 = vector.extract_strided_slice %31 {offsets = [0, 0], sizes = [1, 384], strides = [1, 1]} : vector<3x384xf32> to vector<1x384xf32>
    %33 = vector.broadcast %32 : vector<1x384xf32> to vector<8x384xf32>
    %34 = arith.mulf %3, %33 : vector<8x384xf32>
    %35 = arith.addf %12, %34 : vector<8x384xf32>
    %36 = vector.extract_strided_slice %31 {offsets = [1, 0], sizes = [1, 384], strides = [1, 1]} : vector<3x384xf32> to vector<1x384xf32>
    %37 = vector.broadcast %36 : vector<1x384xf32> to vector<8x384xf32>
    %38 = arith.mulf %6, %37 : vector<8x384xf32>
    %39 = arith.addf %35, %38 : vector<8x384xf32>
    %40 = vector.extract_strided_slice %31 {offsets = [2, 0], sizes = [1, 384], strides = [1, 1]} : vector<3x384xf32> to vector<1x384xf32>
    %41 = vector.broadcast %40 : vector<1x384xf32> to vector<8x384xf32>
    %42 = arith.mulf %9, %41 : vector<8x384xf32>
    %43 = arith.addf %39, %42 : vector<8x384xf32>
    %c1_11 = arith.constant 1 : index
    %c0_12 = arith.constant 0 : index
    %c0_13 = arith.constant 0 : index
    %44 = vector.load %arg4[%c1_11, %c0_12, %c0_13] : memref<2x8x384xf32, #tpu.memory_space<vmem>>, vector<1x8x384xf32>
    %45 = vector.shape_cast %44 : vector<1x8x384xf32> to vector<8x384xf32>
    %46 = vector.shape_cast %43 : vector<8x384xf32> to vector<1x8x384xf32>
    tpu.vector_store %arg4[%c1_11, %c0_12, %c0_13], %46 {strides = array<i32>} : memref<2x8x384xf32, #tpu.memory_space<vmem>>, vector<1x8x384xf32>,
    return
  }
  func.func @transform_0(%arg0: i32) -> (i32, i32, i32) {
    %c0_i32 = arith.constant 0 : i32
    %c0_i32_0 = arith.constant 0 : i32
    %c0_i32_1 = arith.constant 0 : i32
    return %c0_i32, %c0_i32_0, %arg0 : i32, i32, i32
  }
  func.func @transform_1(%arg0: i32) -> (i32, i32) {
    %c0_i32 = arith.constant 0 : i32
    %c0_i32_0 = arith.constant 0 : i32
    %c0_i32_1 = arith.constant 0 : i32
    return %c0_i32, %c0_i32_0 : i32, i32
  }
  func.func @transform_2(%arg0: i32) -> (i32, i32) {
    %c0_i32 = arith.constant 0 : i32
    %c0_i32_0 = arith.constant 0 : i32
    %c0_i32_1 = arith.constant 0 : i32
    return %c0_i32, %c0_i32_0 : i32, i32
  }
  func.func @transform_3(%arg0: i32) -> (i32, i32, i32) {
    %c0_i32 = arith.constant 0 : i32
    %c0_i32_0 = arith.constant 0 : i32
    %c0_i32_1 = arith.constant 0 : i32
    return %c0_i32, %c0_i32_0, %arg0 : i32, i32, i32
  }
}

</mosaic_0001>

<bundles_post_ra>
// kernel: tpu_custom_call.1
= control target key start
LH: loop header
LB: loop body
LE: loop exit
PB: predicated region body
PF: predicated region fallthrough
CT: control target
= control target key end

     0   :  { %v302_v2 = vmov 0   ;;  %s382_s0 = inlined_call_operand.vmem [shape: f32[2,3,384], index: 0, kind: input, shape index: {}]   ;;  %s383_s1 = inlined_call_operand.vmem [shape: f32[8,3], index: 1, kind: input, shape index: {}]   ;;  %s384_s2 = inlined_call_operand.vmem [shape: f32[8,1], index: 2, kind: input, shape index: {}]   ;;  %s385_s3 = inlined_call_operand.hbm [shape: f32[2,8,384], index: 3, kind: output, shape index: {}]  }
   0x1   :  { %v15_v0 = vld [vmem:[%s383_s1] sm:$0xff]  ;;  %273 = vset.pattern.permute.xlu0 %v302_v2  ;;  %275 = vset.pattern.permute.xlu1 %v302_v2 }
   0x2   :  { %v29_v1 = vld [vmem:[%s384_s2] sm:$0xff]  ;;  %18 = vperm.xlu0 %273, %v15_v0  }
   0x3   :  { %32 = vperm.xlu1 %275, %v29_v1  }
   0x4   :  { %8 = vsyncpa [#allocation3], 0  ;;  %v303_v3 = vmov 1   ;;  %v304_v4 = vmov 2   ;;  %v39_v5 = vlaneseq  ;;  %v35_v9 = vld [vmem:[%s382_s0] sm:$0x77] }
   0x5   :  { %v36_v10 = vld [vmem:[%s382_s0 + $0x8] sm:$0x7]  ;;  %v265_v12 = vld [vmem:[%s382_s0 + $0xc] sm:$0x77]  ;;  %v266_v13 = vld [vmem:[%s382_s0 + $0x14] sm:$0x7] }
   0x6   :  { %274 = vset.pattern.permute.xlu0 %v303_v3  ;;  %v40_v6 = vshrl.u32 %v39_v5, 7  ;;  %s305_s0 = smov [#allocation2]  }
   0x7   :  { %276 = vset.pattern.permute.xlu1 %v304_v4  ;;  %22 = vperm.xlu0 %274, %v15_v0   ;;  %s254_s22 = sshll.u32 %s305_s0, 4  ;;  %s255_s22 = int_to_ptr.vmem [resolvable:$true] %s254_s22 }
   0x8   :  { %26 = vperm.xlu1 %276, %v15_v0   ;;  %v41_v7 = vsub.s32 0, %v40_v6  ;;  %v45_v8 = vsub.s32 4, %v40_v6  ;;  %v340_v11 = vsub.s32 1, %v40_v6  ;;  %v78_v14 = vsub.s32 5, %v40_v6  ;;  %s278_s23 = scalar_lea.vmem %s255_s22, 768  ;;  %p283_p1 = scmp.lt.s32.totalorder %s255_s22, %s255_s22 }
   0x9   :  { %v349_v23 = vsub.s32 2, %v40_v6  ;;  %v111_v24 = vsub.s32 6, %v40_v6  ;;  %p279_p0 = scmp.ne.s32.totalorder %s255_s22, %s278_s23  ;;  %p284_p2 = scmp.lt.s32.totalorder %s278_s23, %s278_s23 }
   0xa   :  { %v42_v15 = vrot.slane %v35_v9, %v41_v7  ;;  %v46_v16 = vrot.slane %v35_v9, %v45_v8  ;;  %v50_v17 = vrot.slane %v36_v10, %v41_v7  ;;  %v149_v18 = vrot.slane %v265_v12, %v41_v7 }
   0xb   :  { %277 = vset.pattern.permute.xlu0 %v302_v2  ;;  %v153_v19 = vrot.slane %v265_v12, %v45_v8  ;;  %v157_v20 = vrot.slane %v266_v13, %v41_v7  ;;  %v75_v21 = vrot.slane %v35_v9, %v340_v11  ;;  %v79_v22 = vrot.slane %v35_v9, %v78_v14  ;;  %p285_p3 = por %p284_p2, %p283_p1 }
   0xc   :  { %v57_v25 = vrot.slane %v42_v15, %v41_v7  ;;  %v61_v26 = vrot.slane %v46_v16, %v41_v7  ;;  %v83_v27 = vrot.slane %v36_v10, %v340_v11  ;;  %v182_v28 = vrot.slane %v265_v12, %v340_v11 }
   0xd   :  { %v65_v29 = vrot.slane %v50_v17, %v41_v7  ;;  %v164_v30 = vrot.slane %v149_v18, %v41_v7  ;;  %v168_v31 = vrot.slane %v153_v19, %v41_v7  ;;  %v172_v32 = vrot.slane %v157_v20, %v41_v7  ;;  %p286_p4 = pnand %p285_p3, %p279_p0 }
   0xe   :  { %v90_v33 = vrot.slane %v75_v21, %v340_v11  ;;  %v94_v34 = vrot.slane %v79_v22, %v340_v11  ;;  %v186_v35 = vrot.slane %v265_v12, %v78_v14  ;;  %v190_v36 = vrot.slane %v266_v13, %v340_v11 }
   0xf   :  { %v108_v37 = vrot.slane %v35_v9, %v349_v23  ;;  %v112_v38 = vrot.slane %v35_v9, %v111_v24  ;;  %v116_v39 = vrot.slane %v36_v10, %v349_v23  ;;  %v215_v40 = vrot.slane %v265_v12, %v349_v23 }
  0x10   :  { %v98_v43 = vrot.slane %v83_v27, %v340_v11  ;;  %v197_v44 = vrot.slane %v182_v28, %v340_v11  ;;  %v219_v45 = vrot.slane %v265_v12, %v111_v24  ;;  %v223_v46 = vrot.slane %v266_v13, %v349_v23 }
  0x11   :  { %v201_v53 = vrot.slane %v186_v35, %v340_v11  ;;  %v205_v54 = vrot.slane %v190_v36, %v340_v11  ;;  %v123_v55 = vrot.slane %v108_v37, %v349_v23  ;;  %v127_v56 = vrot.slane %v112_v38, %v349_v23 }
  0x12   :  { %v131_v57 = vrot.slane %v116_v39, %v349_v23  ;;  %v230_v58 = vrot.slane %v215_v40, %v349_v23  ;;  %v234_v61 = vrot.slane %v219_v45, %v349_v23  ;;  %v238_v62 = vrot.slane %v223_v46, %v349_v23 }
  0x81   :  { %v19_v41 = vpop.permute.xlu0 %18 }
  0x82   :  { %v33_v42 = vpop.permute.xlu1 %32  ;;  %v66_v47 = vmul.f32 %v57_v25, %v19_v41  ;;  %v67_v48 = vmul.f32 %v61_v26, %v19_v41  ;;  %v68_v49 = vmul.f32 %v65_v29, %v19_v41  ;;  %v173_v50 = vmul.f32 %v164_v30, %v19_v41 }
  0x83   :  { %v174_v51 = vmul.f32 %v168_v31, %v19_v41  ;;  %v175_v52 = vmul.f32 %v172_v32, %v19_v41 }
  0x84   :  { %v69_v59 = vadd.f32 %v66_v47, %v33_v42  ;;  %v70_v60 = vadd.f32 %v67_v48, %v33_v42  ;;  %v71_v63 = vadd.f32 %v68_v49, %v33_v42  ;;  %v176_v0 = vadd.f32 %v173_v50, %v33_v42 }
  0x85   :  { %v177_v1 = vadd.f32 %v174_v51, %v33_v42  ;;  %v178_v2 = vadd.f32 %v175_v52, %v33_v42 }
  0x86   :  { %v23_v3 = vpop.permute.xlu0 %22 }
  0x87   :  { %v27_v4 = vpop.permute.xlu1 %26  ;;  %v99_v5 = vmul.f32 %v90_v33, %v23_v3  ;;  %v100_v6 = vmul.f32 %v94_v34, %v23_v3  ;;  %v101_v7 = vmul.f32 %v98_v43, %v23_v3  ;;  %v206_v8 = vmul.f32 %v197_v44, %v23_v3 }
  0x88   :  { %v207_v9 = vmul.f32 %v201_v53, %v23_v3  ;;  %v208_v10 = vmul.f32 %v205_v54, %v23_v3  ;;  %v132_v11 = vmul.f32 %v123_v55, %v27_v4  ;;  %v133_v12 = vmul.f32 %v127_v56, %v27_v4 }
  0x89   :  { %v102_v13 = vadd.f32 %v99_v5, %v69_v59  ;;  %v103_v14 = vadd.f32 %v100_v6, %v70_v60  ;;  %v104_v15 = vadd.f32 %v101_v7, %v71_v63  ;;  %v209_v16 = vadd.f32 %v206_v8, %v176_v0 }
  0x8a   :  { %v210_v17 = vadd.f32 %v207_v9, %v177_v1  ;;  %v211_v18 = vadd.f32 %v208_v10, %v178_v2  ;;  %v134_v19 = vmul.f32 %v131_v57, %v27_v4  ;;  %v239_v20 = vmul.f32 %v230_v58, %v27_v4 }
  0x8b   :  { %v135_v21 = vadd.f32 %v132_v11, %v102_v13  ;;  %v136_v22 = vadd.f32 %v133_v12, %v103_v14  ;;  %v240_v23 = vmul.f32 %v234_v61, %v27_v4  ;;  %v241_v24 = vmul.f32 %v238_v62, %v27_v4 }
  0x8c   :  { %v137_v25 = vadd.f32 %v134_v19, %v104_v15  ;;  %v242_v26 = vadd.f32 %v239_v20, %v209_v16 }
  0x8d   :  { %138 = vst [vmem:[#allocation2] sm:$0xff] %v135_v21  ;;  %139 = vst [vmem:[#allocation2 + $0x8] sm:$0xff] %v136_v22  ;;  %v243_v27 = vadd.f32 %v240_v23, %v210_v17  ;;  %v244_v28 = vadd.f32 %v241_v24, %v211_v18 }
  0x8e   :  { %140 = vst [vmem:[#allocation2 + $0x10] sm:$0xff] %v137_v25  ;;  %246 = vst [vmem:[#allocation2 + $0x18] sm:$0xff] %v242_v26 }
  0x8f   :  { %247 = vst [vmem:[#allocation2 + $0x20] sm:$0xff] %v243_v27  ;;  %248 = vst [vmem:[#allocation2 + $0x28] sm:$0xff] %v244_v28 }
  0x90   :  { %289 = shalt.err (!%p286_p4)
}
  0x91   :  { %s290_s26 = scalar_lea.hbm %s385_s3, 768 }
  0x92   :  { %p291_p5 = scmp.ne.s32.totalorder %s385_s3, %s290_s26  ;;  %p294_p6 = scmp.lt.u32.totalorder %s290_s26, %s385_s3 }
  0x94   :  { %p296_p7 = pnand %p294_p6, %p291_p5 }
  0x96   :  { %299 = shalt.err (!%p296_p7)
}
  0x97   :  { %s306_s4 = smov 384   ;;  %s307_s5 = smov 24  }
  0x98   :  { %260 = dma.vmem_to_hbm [thread:$0]  %s255_s22, 768, %s385_s3, [#allocation3], %s306_s4, %s306_s4, %s307_s5  }
  0x99   :  { %300 = dma.done.wait [#allocation3], 768  }
  0x9a   :  { %301 = vsyncadd [#allocation3], 4294966528 }
  0x9b   :  { %264 = vsyncpa [#allocation3], 1 }

</bundles_post_ra>
